<compile_context>
chip_gen: v7x
topology: tpu7x:2x2x1
jax: 0.10.0
libtpu: 0.0.40
codegen_flags: <defaults>
</compile_context>

<pallas_src>
import jax
import jax.numpy as jnp
from jax.experimental import pallas as pl
from jax.experimental.pallas import tpu as pltpu

_EPS = 1e-5
_VMEM_LIMIT = 32 * 1024 * 1024   # <= scoped default on v6e/v7x, < physical on all chips


# ----------------------------- kernel helpers ------------------------------

def _shifted_taps(x):
    """x: (C, L) f32 -> im2col (3C, L): rows [x[:,l-1] ; x[:,l] ; x[:,l+1]],
    zero at the boundaries. Built from static lane slices + one zero column
    (no (L+2)-wide padded activation copy)."""
    C, L = x.shape
    zcol = jnp.zeros((C, 1), x.dtype)
    left = jnp.concatenate([zcol, x[:, :L - 1]], axis=1)    # x[:, l-1]
    right = jnp.concatenate([x[:, 1:], zcol], axis=1)       # x[:, l+1]
    return jnp.concatenate([left, x, right], axis=0)        # (3C, L)


def _accumulate_stats(stats_ref, h):
    """Accumulate per-channel [sum, sumsq] of h (Cout, L2) across the batch grid."""
    s = jnp.sum(h, axis=-1, keepdims=True)                  # (Cout, 1)
    ss = jnp.sum(h * h, axis=-1, keepdims=True)             # (Cout, 1)
    st = jnp.concatenate([s, ss], axis=1)                   # (Cout, 2)

    @pl.when(pl.program_id(0) == 0)
    def _():
        stats_ref[...] = jnp.zeros_like(stats_ref)

    stats_ref[...] += st


# --------------------------------- kernels ---------------------------------

def _conv1_kernel(p_ref, w1_ref, h1_ref, stats1_ref):
    # p_ref: (1, Cin, L2) bf16 ; w1_ref: (Cout, 3*Cin) bf16
    x = p_ref[0].astype(jnp.float32)                                    # (Cin, L2)
    cols = _shifted_taps(x).astype(jnp.bfloat16)                        # (3Cin, L2)
    h1 = jnp.dot(w1_ref[...], cols, preferred_element_type=jnp.float32)  # (Cout, L2) f32
    # conv bias omitted: exactly cancelled by the following training-mode BN.
    h1_ref[0] = h1.astype(h1_ref.dtype)
    _accumulate_stats(stats1_ref, h1)


def _bn1_conv2_stats_kernel(h1_ref, sc1_ref, sh1_ref, w2_ref, stats2_ref):
    # BN1 (folded scale/shift) + ReLU, then conv2 as one fused-K matmul.
    # Only the per-channel batch statistics leave the kernel (no h2 HBM write).
    a = jnp.maximum(h1_ref[0].astype(jnp.float32) * sc1_ref[...] + sh1_ref[...], 0.0)
    cols = _shifted_taps(a).astype(jnp.bfloat16)                        # (3Cout, L2)
    h2 = jnp.dot(w2_ref[...], cols, preferred_element_type=jnp.float32)
    _accumulate_stats(stats2_ref, h2)


def _bn1_conv2_bn2_kernel(h1_ref, sc1_ref, sh1_ref, w2_ref, sc2_ref, sh2_ref, o_ref):
    # Recompute conv2 from h1 (identical numerical path as pass B), then apply
    # folded BN2 + ReLU on the f32 result and emit the final NCL output.
    a = jnp.maximum(h1_ref[0].astype(jnp.float32) * sc1_ref[...] + sh1_ref[...], 0.0)
    cols = _shifted_taps(a).astype(jnp.bfloat16)
    h2 = jnp.dot(w2_ref[...], cols, preferred_element_type=jnp.float32)
    o_ref[0] = jnp.maximum(h2 * sc2_ref[...] + sh2_ref[...], 0.0).astype(o_ref.dtype)


# --------------------------------- wrapper ---------------------------------

def _fold_bn(stats, count, gamma, beta):
    """Fold training-mode BN (biased batch stats) + affine into scale/shift."""
    mean = stats[:, 0] / count
    var = jnp.maximum(stats[:, 1] / count - mean * mean, 0.0)
    scale = gamma * jax.lax.rsqrt(var + _EPS)
    shift = beta - mean * scale
    return scale[:, None].astype(jnp.float32), shift[:, None].astype(jnp.float32)


def down_block(x_ncl, params):
    """x_ncl: (N, Cin, L) f32 (PyTorch NCL layout). Returns (N, Cout, L//2) f32."""
    N, Cin, L = x_ncl.shape
    assert L % 2 == 0
    L2 = L // 2
    Cout = params["w1"].shape[0]

    # MaxPool1d(2): contiguous reshape + minor-axis max (one fused XLA pass,
    # no strided-slice copies). Ship bf16 to halve the kernel's input DMA.
    pooled = jnp.max(x_ncl.reshape(N, Cin, L2, 2), axis=-1).astype(jnp.bfloat16)

    # Pack conv weights (Cout, Cin, 3) -> (Cout, 3*Cin), tap-major, bf16 for MXU.
    w1m = jnp.transpose(params["w1"], (0, 2, 1)).reshape(Cout, 3 * Cin).astype(jnp.bfloat16)
    w2m = jnp.transpose(params["w2"], (0, 2, 1)).reshape(Cout, 3 * Cout).astype(jnp.bfloat16)

    cp_acc = pltpu.CompilerParams(dimension_semantics=("arbitrary",),   # stats accumulator
                                  vmem_limit_bytes=_VMEM_LIMIT)
    cp_par = pltpu.CompilerParams(dimension_semantics=("parallel",),    # megacore-shardable
                                  vmem_limit_bytes=_VMEM_LIMIT)

    per_n = lambda c: pl.BlockSpec((1, c, L2), lambda n: (n, 0, 0))
    full = lambda shape: pl.BlockSpec(shape, lambda n: (0,) * len(shape))

    # Pass A: pooled x -> conv1 ; write h1 (bf16) ; accumulate BN1 sum/sumsq.
    h1, stats1 = pl.pallas_call(
        _conv1_kernel,
        grid=(N,),
        in_specs=[per_n(Cin), full((Cout, 3 * Cin))],
        out_specs=(per_n(Cout), full((Cout, 2))),
        out_shape=(jax.ShapeDtypeStruct((N, Cout, L2), jnp.bfloat16),
                   jax.ShapeDtypeStruct((Cout, 2), jnp.float32)),
        compiler_params=cp_acc,
    )(pooled, w1m)

    sc1, sh1 = _fold_bn(stats1, N * L2, params["g1"], params["be1"])

    # Pass B: BN1 + ReLU -> conv2 ; accumulate BN2 sum/sumsq only (h2 stays in VMEM).
    stats2 = pl.pallas_call(
        _bn1_conv2_stats_kernel,
        grid=(N,),
        in_specs=[per_n(Cout), full((Cout, 1)), full((Cout, 1)), full((Cout, 3 * Cout))],
        out_specs=full((Cout, 2)),
        out_shape=jax.ShapeDtypeStruct((Cout, 2), jnp.float32),
        compiler_params=cp_acc,
    )(h1, sc1, sh1, w2m)

    sc2, sh2 = _fold_bn(stats2, N * L2, params["g2"], params["be2"])

    # Pass C: BN1+ReLU -> conv2 (recompute) -> BN2+ReLU -> final (N, Cout, L2) NCL.
    out = pl.pallas_call(
        _bn1_conv2_bn2_kernel,
        grid=(N,),
        in_specs=[per_n(Cout), full((Cout, 1)), full((Cout, 1)),
                  full((Cout, 3 * Cout)), full((Cout, 1)), full((Cout, 1))],
        out_specs=per_n(Cout),
        out_shape=jax.ShapeDtypeStruct((N, Cout, L2), jnp.float32),
        compiler_params=cp_par,
    )(h1, sc1, sh1, w2m, sc2, sh2)
    return out


# ------------------------------ params / reference -------------------------

def make_params(cin, cout, key):
    k1, k2, k3, k4 = jax.random.split(key, 4)
    return {
        # PyTorch Conv1d weight layout: (out_channels, in_channels, kernel_size)
        "w1": 0.1 * jax.random.normal(k1, (cout, cin, 3), jnp.float32),
        "b1": 0.1 * jax.random.normal(k2, (cout,), jnp.float32),   # cancelled by BN (training mode)
        "g1": jnp.ones((cout,), jnp.float32),                      # BN gamma init
        "be1": jnp.zeros((cout,), jnp.float32),                    # BN beta init
        "w2": 0.1 * jax.random.normal(k3, (cout, cout, 3), jnp.float32),
        "b2": 0.1 * jax.random.normal(k4, (cout,), jnp.float32),
        "g2": jnp.ones((cout,), jnp.float32),
        "be2": jnp.zeros((cout,), jnp.float32),
    }


def reference(x_ncl, params):
    """Pure-JAX f32 reference with PyTorch semantics (conv bias kept, training-mode BN)."""
    N, Cin, L = x_ncl.shape
    L2 = L // 2
    p = jnp.max(x_ncl.reshape(N, Cin, L2, 2), axis=-1)             # MaxPool1d(2)

    def conv(a, w, b):                                             # a:(N,C,L2) w:(D,C,3)
        ap = jnp.pad(a, ((0, 0), (0, 0), (1, 1)))
        y = sum(jnp.einsum('ncl,dc->ndl', ap[:, :, k:k + L2], w[:, :, k]) for k in range(3))
        return y + b[None, :, None]

    def bn_relu(y, g, be):
        m = y.mean((0, 2), keepdims=True)
        v = ((y - m) ** 2).mean((0, 2), keepdims=True)
        return jnp.maximum((y - m) / jnp.sqrt(v + _EPS) * g[None, :, None]
                           + be[None, :, None], 0.0)

    y = bn_relu(conv(p, params["w1"], params["b1"]), params["g1"], params["be1"])
    y = bn_relu(conv(y, params["w2"], params["b2"]), params["g2"], params["be2"])
    return y


if __name__ == "__main__":
    key = jax.random.PRNGKey(0)
    kx, kp = jax.random.split(key)

    N, Cin, Cout, L = 2, 4, 8, 16
    x = jax.random.normal(kx, (N, Cin, L), jnp.float32)
    params = make_params(Cin, Cout, kp)

    out = jax.block_until_ready(jax.jit(down_block)(x, params))
    ref = reference(x, params)

    assert out.shape == (N, Cout, L // 2), out.shape
    err = float(jnp.max(jnp.abs(out - ref)))
    # Kernel uses bf16 MXU operands / bf16 h1 intermediate vs the f32 reference;
    # layout or tap-alignment bugs would produce O(1) errors.
    assert err < 1e-1, err
    print("KERNEL_OK")
</pallas_src>

<mosaic_0001>
module attributes {stable_mosaic.version = 11 : i64} {
  func.func @_conv1_kernel(%arg0: i32, %arg1: memref<1x4x8xbf16, #tpu.memory_space<vmem>>, %arg2: memref<8x12xbf16, #tpu.memory_space<vmem>>, %arg3: memref<1x8x8xbf16, #tpu.memory_space<vmem>>, %arg4: memref<8x2xf32, #tpu.memory_space<vmem>>) attributes {dimension_semantics = [#tpu.dimension_semantics<arbitrary>], iteration_bounds = array<i64: 2>, scalar_prefetch = 0 : i64, scratch_operands = 0 : i64, tpu.core_type = #tpu.core_type<tc>, window_params = [{transform_indices = @transform_0, window_bounds = array<i64: 1, 4, 8>}, {pipeline_mode = #tpu.pipeline_mode<synchronous>, transform_indices = @transform_1, window_bounds = array<i64: 8, 12>}, {transform_indices = @transform_2, window_bounds = array<i64: 1, 8, 8>}, {pipeline_mode = #tpu.pipeline_mode<synchronous>, transform_indices = @transform_3, window_bounds = array<i64: 8, 2>}]} {
    %c0 = arith.constant 0 : index
    %c0_0 = arith.constant 0 : index
    %c0_1 = arith.constant 0 : index
    %0 = vector.load %arg1[%c0, %c0_0, %c0_1] : memref<1x4x8xbf16, #tpu.memory_space<vmem>>, vector<1x4x8xbf16>
    %1 = vector.shape_cast %0 : vector<1x4x8xbf16> to vector<4x8xbf16>
    %2 = arith.extf %1 : vector<4x8xbf16> to vector<4x8xf32>
    %cst = arith.constant 0.000000e+00 : f32
    %3 = vector.broadcast %cst : f32 to vector<4x1xf32>
    %4 = vector.extract_strided_slice %2 {offsets = [0, 0], sizes = [4, 7], strides = [1, 1]} : vector<4x8xf32> to vector<4x7xf32>
    %5 = tpu.concatenate %3, %4 in 1 : vector<4x1xf32>, vector<4x7xf32> -> vector<4x8xf32>
    %6 = vector.extract_strided_slice %2 {offsets = [0, 1], sizes = [4, 7], strides = [1, 1]} : vector<4x8xf32> to vector<4x7xf32>
    %7 = tpu.concatenate %6, %3 in 1 : vector<4x7xf32>, vector<4x1xf32> -> vector<4x8xf32>
    %8 = tpu.concatenate %5, %2, %7 in 0 : vector<4x8xf32>, vector<4x8xf32>, vector<4x8xf32> -> vector<12x8xf32>
    %9 = arith.truncf %8 : vector<12x8xf32> to vector<12x8xbf16>
    %c0_2 = arith.constant 0 : index
    %c0_3 = arith.constant 0 : index
    %10 = vector.load %arg2[%c0_2, %c0_3] : memref<8x12xbf16, #tpu.memory_space<vmem>>, vector<8x12xbf16>
    %cst_4 = arith.constant dense<0.000000e+00> : vector<8x8xf32>
    %11 = tpu.matmul %10, %9, %cst_4 {dimension_numbers = #tpu.dot_dimension_numbers<[1], [0], [0], [1], [0, 0, 1, 1], [], []>} : vector<8x12xbf16>, vector<12x8xbf16>, vector<8x8xf32> -> vector<8x8xf32>
    %12 = arith.truncf %11 : vector<8x8xf32> to vector<8x8xbf16>
    %c0_5 = arith.constant 0 : index
    %c0_6 = arith.constant 0 : index
    %c0_7 = arith.constant 0 : index
    %13 = vector.load %arg3[%c0_5, %c0_6, %c0_7] : memref<1x8x8xbf16, #tpu.memory_space<vmem>>, vector<1x8x8xbf16>
    %14 = vector.shape_cast %13 : vector<1x8x8xbf16> to vector<8x8xbf16>
    %15 = vector.shape_cast %12 : vector<8x8xbf16> to vector<1x8x8xbf16>
    tpu.vector_store %arg3[%c0_5, %c0_6, %c0_7], %15 {strides = array<i32>} : memref<1x8x8xbf16, #tpu.memory_space<vmem>>, vector<1x8x8xbf16>,
    %cst_8 = arith.constant dense<0.000000e+00> : vector<8xf32>
    %16 = vector.multi_reduction <add>, %11, %cst_8 [1] : vector<8x8xf32> to vector<8xf32>
    %17 = vector.shape_cast %16 : vector<8xf32> to vector<8x1xf32>
    %18 = arith.mulf %11, %11 : vector<8x8xf32>
    %cst_9 = arith.constant dense<0.000000e+00> : vector<8xf32>
    %19 = vector.multi_reduction <add>, %18, %cst_9 [1] : vector<8x8xf32> to vector<8xf32>
    %20 = vector.shape_cast %19 : vector<8xf32> to vector<8x1xf32>
    %21 = tpu.concatenate %17, %20 in 1 : vector<8x1xf32>, vector<8x1xf32> -> vector<8x2xf32>
    %c0_i32 = arith.constant 0 : i32
    %22 = arith.cmpi eq, %arg0, %c0_i32 : i32
    %23 = arith.extui %22 : i1 to i32
    %c0_i32_10 = arith.constant 0 : i32
    %24 = arith.cmpi ne, %23, %c0_i32_10 : i32
    scf.if %24 {
      %cst_15 = arith.constant 0.000000e+00 : f32
      %28 = vector.broadcast %cst_15 : f32 to vector<8x2xf32>
      %c0_16 = arith.constant 0 : index
      %c0_17 = arith.constant 0 : index
      %29 = vector.load %arg4[%c0_16, %c0_17] : memref<8x2xf32, #tpu.memory_space<vmem>>, vector<8x2xf32>
      tpu.vector_store %arg4[%c0_16, %c0_17], %28 {strides = array<i32>} : memref<8x2xf32, #tpu.memory_space<vmem>>, vector<8x2xf32>,
    } else {
    }
    %c0_11 = arith.constant 0 : index
    %c0_12 = arith.constant 0 : index
    %25 = vector.load %arg4[%c0_11, %c0_12] : memref<8x2xf32, #tpu.memory_space<vmem>>, vector<8x2xf32>
    %26 = arith.addf %25, %21 : vector<8x2xf32>
    %c0_13 = arith.constant 0 : index
    %c0_14 = arith.constant 0 : index
    %27 = vector.load %arg4[%c0_13, %c0_14] : memref<8x2xf32, #tpu.memory_space<vmem>>, vector<8x2xf32>
    tpu.vector_store %arg4[%c0_13, %c0_14], %26 {strides = array<i32>} : memref<8x2xf32, #tpu.memory_space<vmem>>, vector<8x2xf32>,
    return
  }
  func.func @transform_0(%arg0: i32) -> (i32, i32, i32) {
    %c0_i32 = arith.constant 0 : i32
    %c0_i32_0 = arith.constant 0 : i32
    %c0_i32_1 = arith.constant 0 : i32
    return %arg0, %c0_i32, %c0_i32_0 : i32, i32, i32
  }
  func.func @transform_1(%arg0: i32) -> (i32, i32) {
    %c0_i32 = arith.constant 0 : i32
    %c0_i32_0 = arith.constant 0 : i32
    %c0_i32_1 = arith.constant 0 : i32
    return %c0_i32, %c0_i32_0 : i32, i32
  }
  func.func @transform_2(%arg0: i32) -> (i32, i32, i32) {
    %c0_i32 = arith.constant 0 : i32
    %c0_i32_0 = arith.constant 0 : i32
    %c0_i32_1 = arith.constant 0 : i32
    return %arg0, %c0_i32, %c0_i32_0 : i32, i32, i32
  }
  func.func @transform_3(%arg0: i32) -> (i32, i32) {
    %c0_i32 = arith.constant 0 : i32
    %c0_i32_0 = arith.constant 0 : i32
    %c0_i32_1 = arith.constant 0 : i32
    return %c0_i32, %c0_i32_0 : i32, i32
  }
}

module attributes {stable_mosaic.version = 11 : i64} {
  func.func @_bn1_conv2_stats_kernel(%arg0: i32, %arg1: memref<1x8x8xbf16, #tpu.memory_space<vmem>>, %arg2: memref<8x1xf32, #tpu.memory_space<vmem>>, %arg3: memref<8x1xf32, #tpu.memory_space<vmem>>, %arg4: memref<8x24xbf16, #tpu.memory_space<vmem>>, %arg5: memref<8x2xf32, #tpu.memory_space<vmem>>) attributes {dimension_semantics = [#tpu.dimension_semantics<arbitrary>], iteration_bounds = array<i64: 2>, scalar_prefetch = 0 : i64, scratch_operands = 0 : i64, tpu.core_type = #tpu.core_type<tc>, window_params = [{transform_indices = @transform_0, window_bounds = array<i64: 1, 8, 8>}, {pipeline_mode = #tpu.pipeline_mode<synchronous>, transform_indices = @transform_1, window_bounds = array<i64: 8, 1>}, {pipeline_mode = #tpu.pipeline_mode<synchronous>, transform_indices = @transform_2, window_bounds = array<i64: 8, 1>}, {pipeline_mode = #tpu.pipeline_mode<synchronous>, transform_indices = @transform_3, window_bounds = array<i64: 8, 24>}, {pipeline_mode = #tpu.pipeline_mode<synchronous>, transform_indices = @transform_4, window_bounds = array<i64: 8, 2>}]} {
    %c0 = arith.constant 0 : index
    %c0_0 = arith.constant 0 : index
    %c0_1 = arith.constant 0 : index
    %0 = vector.load %arg1[%c0, %c0_0, %c0_1] : memref<1x8x8xbf16, #tpu.memory_space<vmem>>, vector<1x8x8xbf16>
    %1 = vector.shape_cast %0 : vector<1x8x8xbf16> to vector<8x8xbf16>
    %2 = arith.extf %1 : vector<8x8xbf16> to vector<8x8xf32>
    %c0_2 = arith.constant 0 : index
    %c0_3 = arith.constant 0 : index
    %3 = vector.load %arg2[%c0_2, %c0_3] : memref<8x1xf32, #tpu.memory_space<vmem>>, vector<8x1xf32>
    %4 = vector.broadcast %3 : vector<8x1xf32> to vector<8x8xf32>
    %5 = arith.mulf %2, %4 : vector<8x8xf32>
    %c0_4 = arith.constant 0 : index
    %c0_5 = arith.constant 0 : index
    %6 = vector.load %arg3[%c0_4, %c0_5] : memref<8x1xf32, #tpu.memory_space<vmem>>, vector<8x1xf32>
    %7 = vector.broadcast %6 : vector<8x1xf32> to vector<8x8xf32>
    %8 = arith.addf %5, %7 : vector<8x8xf32>
    %cst = arith.constant 0.000000e+00 : f32
    %9 = vector.broadcast %cst : f32 to vector<8x8xf32>
    %10 = arith.maximumf %8, %9 : vector<8x8xf32>
    %cst_6 = arith.constant 0.000000e+00 : f32
    %11 = vector.broadcast %cst_6 : f32 to vector<8x1xf32>
    %12 = vector.extract_strided_slice %10 {offsets = [0, 0], sizes = [8, 7], strides = [1, 1]} : vector<8x8xf32> to vector<8x7xf32>
    %13 = tpu.concatenate %11, %12 in 1 : vector<8x1xf32>, vector<8x7xf32> -> vector<8x8xf32>
    %14 = vector.extract_strided_slice %10 {offsets = [0, 1], sizes = [8, 7], strides = [1, 1]} : vector<8x8xf32> to vector<8x7xf32>
    %15 = tpu.concatenate %14, %11 in 1 : vector<8x7xf32>, vector<8x1xf32> -> vector<8x8xf32>
    %16 = tpu.concatenate %13, %10, %15 in 0 : vector<8x8xf32>, vector<8x8xf32>, vector<8x8xf32> -> vector<24x8xf32>
    %17 = arith.truncf %16 : vector<24x8xf32> to vector<24x8xbf16>
    %c0_7 = arith.constant 0 : index
    %c0_8 = arith.constant 0 : index
    %18 = vector.load %arg4[%c0_7, %c0_8] : memref<8x24xbf16, #tpu.memory_space<vmem>>, vector<8x24xbf16>
    %cst_9 = arith.constant dense<0.000000e+00> : vector<8x8xf32>
    %19 = tpu.matmul %18, %17, %cst_9 {dimension_numbers = #tpu.dot_dimension_numbers<[1], [0], [0], [1], [0, 0, 1, 1], [], []>} : vector<8x24xbf16>, vector<24x8xbf16>, vector<8x8xf32> -> vector<8x8xf32>
    %cst_10 = arith.constant dense<0.000000e+00> : vector<8xf32>
    %20 = vector.multi_reduction <add>, %19, %cst_10 [1] : vector<8x8xf32> to vector<8xf32>
    %21 = vector.shape_cast %20 : vector<8xf32> to vector<8x1xf32>
    %22 = arith.mulf %19, %19 : vector<8x8xf32>
    %cst_11 = arith.constant dense<0.000000e+00> : vector<8xf32>
    %23 = vector.multi_reduction <add>, %22, %cst_11 [1] : vector<8x8xf32> to vector<8xf32>
    %24 = vector.shape_cast %23 : vector<8xf32> to vector<8x1xf32>
    %25 = tpu.concatenate %21, %24 in 1 : vector<8x1xf32>, vector<8x1xf32> -> vector<8x2xf32>
    %c0_i32 = arith.constant 0 : i32
    %26 = arith.cmpi eq, %arg0, %c0_i32 : i32
    %27 = arith.extui %26 : i1 to i32
    %c0_i32_12 = arith.constant 0 : i32
    %28 = arith.cmpi ne, %27, %c0_i32_12 : i32
    scf.if %28 {
      %cst_17 = arith.constant 0.000000e+00 : f32
      %32 = vector.broadcast %cst_17 : f32 to vector<8x2xf32>
      %c0_18 = arith.constant 0 : index
      %c0_19 = arith.constant 0 : index
      %33 = vector.load %arg5[%c0_18, %c0_19] : memref<8x2xf32, #tpu.memory_space<vmem>>, vector<8x2xf32>
      tpu.vector_store %arg5[%c0_18, %c0_19], %32 {strides = array<i32>} : memref<8x2xf32, #tpu.memory_space<vmem>>, vector<8x2xf32>,
    } else {
    }
    %c0_13 = arith.constant 0 : index
    %c0_14 = arith.constant 0 : index
    %29 = vector.load %arg5[%c0_13, %c0_14] : memref<8x2xf32, #tpu.memory_space<vmem>>, vector<8x2xf32>
    %30 = arith.addf %29, %25 : vector<8x2xf32>
    %c0_15 = arith.constant 0 : index
    %c0_16 = arith.constant 0 : index
    %31 = vector.load %arg5[%c0_15, %c0_16] : memref<8x2xf32, #tpu.memory_space<vmem>>, vector<8x2xf32>
    tpu.vector_store %arg5[%c0_15, %c0_16], %30 {strides = array<i32>} : memref<8x2xf32, #tpu.memory_space<vmem>>, vector<8x2xf32>,
    return
  }
  func.func @transform_0(%arg0: i32) -> (i32, i32, i32) {
    %c0_i32 = arith.constant 0 : i32
    %c0_i32_0 = arith.constant 0 : i32
    %c0_i32_1 = arith.constant 0 : i32
    return %arg0, %c0_i32, %c0_i32_0 : i32, i32, i32
  }
  func.func @transform_1(%arg0: i32) -> (i32, i32) {
    %c0_i32 = arith.constant 0 : i32
    %c0_i32_0 = arith.constant 0 : i32
    %c0_i32_1 = arith.constant 0 : i32
    return %c0_i32, %c0_i32_0 : i32, i32
  }
  func.func @transform_2(%arg0: i32) -> (i32, i32) {
    %c0_i32 = arith.constant 0 : i32
    %c0_i32_0 = arith.constant 0 : i32
    %c0_i32_1 = arith.constant 0 : i32
    return %c0_i32, %c0_i32_0 : i32, i32
  }
  func.func @transform_3(%arg0: i32) -> (i32, i32) {
    %c0_i32 = arith.constant 0 : i32
    %c0_i32_0 = arith.constant 0 : i32
    %c0_i32_1 = arith.constant 0 : i32
    return %c0_i32, %c0_i32_0 : i32, i32
  }
  func.func @transform_4(%arg0: i32) -> (i32, i32) {
    %c0_i32 = arith.constant 0 : i32
    %c0_i32_0 = arith.constant 0 : i32
    %c0_i32_1 = arith.constant 0 : i32
    return %c0_i32, %c0_i32_0 : i32, i32
  }
}

module attributes {stable_mosaic.version = 11 : i64} {
  func.func @_bn1_conv2_bn2_kernel(%arg0: i32, %arg1: memref<1x8x8xbf16, #tpu.memory_space<vmem>>, %arg2: memref<8x1xf32, #tpu.memory_space<vmem>>, %arg3: memref<8x1xf32, #tpu.memory_space<vmem>>, %arg4: memref<8x24xbf16, #tpu.memory_space<vmem>>, %arg5: memref<8x1xf32, #tpu.memory_space<vmem>>, %arg6: memref<8x1xf32, #tpu.memory_space<vmem>>, %arg7: memref<1x8x8xf32, #tpu.memory_space<vmem>>) attributes {dimension_semantics = [#tpu.dimension_semantics<parallel>], iteration_bounds = array<i64: 2>, scalar_prefetch = 0 : i64, scratch_operands = 0 : i64, tpu.core_type = #tpu.core_type<tc>, window_params = [{transform_indices = @transform_0, window_bounds = array<i64: 1, 8, 8>}, {pipeline_mode = #tpu.pipeline_mode<synchronous>, transform_indices = @transform_1, window_bounds = array<i64: 8, 1>}, {pipeline_mode = #tpu.pipeline_mode<synchronous>, transform_indices = @transform_2, window_bounds = array<i64: 8, 1>}, {pipeline_mode = #tpu.pipeline_mode<synchronous>, transform_indices = @transform_3, window_bounds = array<i64: 8, 24>}, {pipeline_mode = #tpu.pipeline_mode<synchronous>, transform_indices = @transform_4, window_bounds = array<i64: 8, 1>}, {pipeline_mode = #tpu.pipeline_mode<synchronous>, transform_indices = @transform_5, window_bounds = array<i64: 8, 1>}, {transform_indices = @transform_6, window_bounds = array<i64: 1, 8, 8>}]} {
    %c0 = arith.constant 0 : index
    %c0_0 = arith.constant 0 : index
    %c0_1 = arith.constant 0 : index
    %0 = vector.load %arg1[%c0, %c0_0, %c0_1] : memref<1x8x8xbf16, #tpu.memory_space<vmem>>, vector<1x8x8xbf16>
    %1 = vector.shape_cast %0 : vector<1x8x8xbf16> to vector<8x8xbf16>
    %2 = arith.extf %1 : vector<8x8xbf16> to vector<8x8xf32>
    %c0_2 = arith.constant 0 : index
    %c0_3 = arith.constant 0 : index
    %3 = vector.load %arg2[%c0_2, %c0_3] : memref<8x1xf32, #tpu.memory_space<vmem>>, vector<8x1xf32>
    %4 = vector.broadcast %3 : vector<8x1xf32> to vector<8x8xf32>
    %5 = arith.mulf %2, %4 : vector<8x8xf32>
    %c0_4 = arith.constant 0 : index
    %c0_5 = arith.constant 0 : index
    %6 = vector.load %arg3[%c0_4, %c0_5] : memref<8x1xf32, #tpu.memory_space<vmem>>, vector<8x1xf32>
    %7 = vector.broadcast %6 : vector<8x1xf32> to vector<8x8xf32>
    %8 = arith.addf %5, %7 : vector<8x8xf32>
    %cst = arith.constant 0.000000e+00 : f32
    %9 = vector.broadcast %cst : f32 to vector<8x8xf32>
    %10 = arith.maximumf %8, %9 : vector<8x8xf32>
    %cst_6 = arith.constant 0.000000e+00 : f32
    %11 = vector.broadcast %cst_6 : f32 to vector<8x1xf32>
    %12 = vector.extract_strided_slice %10 {offsets = [0, 0], sizes = [8, 7], strides = [1, 1]} : vector<8x8xf32> to vector<8x7xf32>
    %13 = tpu.concatenate %11, %12 in 1 : vector<8x1xf32>, vector<8x7xf32> -> vector<8x8xf32>
    %14 = vector.extract_strided_slice %10 {offsets = [0, 1], sizes = [8, 7], strides = [1, 1]} : vector<8x8xf32> to vector<8x7xf32>
    %15 = tpu.concatenate %14, %11 in 1 : vector<8x7xf32>, vector<8x1xf32> -> vector<8x8xf32>
    %16 = tpu.concatenate %13, %10, %15 in 0 : vector<8x8xf32>, vector<8x8xf32>, vector<8x8xf32> -> vector<24x8xf32>
    %17 = arith.truncf %16 : vector<24x8xf32> to vector<24x8xbf16>
    %c0_7 = arith.constant 0 : index
    %c0_8 = arith.constant 0 : index
    %18 = vector.load %arg4[%c0_7, %c0_8] : memref<8x24xbf16, #tpu.memory_space<vmem>>, vector<8x24xbf16>
    %cst_9 = arith.constant dense<0.000000e+00> : vector<8x8xf32>
    %19 = tpu.matmul %18, %17, %cst_9 {dimension_numbers = #tpu.dot_dimension_numbers<[1], [0], [0], [1], [0, 0, 1, 1], [], []>} : vector<8x24xbf16>, vector<24x8xbf16>, vector<8x8xf32> -> vector<8x8xf32>
    %c0_10 = arith.constant 0 : index
    %c0_11 = arith.constant 0 : index
    %20 = vector.load %arg5[%c0_10, %c0_11] : memref<8x1xf32, #tpu.memory_space<vmem>>, vector<8x1xf32>
    %21 = vector.broadcast %20 : vector<8x1xf32> to vector<8x8xf32>
    %22 = arith.mulf %19, %21 : vector<8x8xf32>
    %c0_12 = arith.constant 0 : index
    %c0_13 = arith.constant 0 : index
    %23 = vector.load %arg6[%c0_12, %c0_13] : memref<8x1xf32, #tpu.memory_space<vmem>>, vector<8x1xf32>
    %24 = vector.broadcast %23 : vector<8x1xf32> to vector<8x8xf32>
    %25 = arith.addf %22, %24 : vector<8x8xf32>
    %cst_14 = arith.constant 0.000000e+00 : f32
    %26 = vector.broadcast %cst_14 : f32 to vector<8x8xf32>
    %27 = arith.maximumf %25, %26 : vector<8x8xf32>
    %c0_15 = arith.constant 0 : index
    %c0_16 = arith.constant 0 : index
    %c0_17 = arith.constant 0 : index
    %28 = vector.load %arg7[%c0_15, %c0_16, %c0_17] : memref<1x8x8xf32, #tpu.memory_space<vmem>>, vector<1x8x8xf32>
    %29 = vector.shape_cast %28 : vector<1x8x8xf32> to vector<8x8xf32>
    %30 = vector.shape_cast %27 : vector<8x8xf32> to vector<1x8x8xf32>
    tpu.vector_store %arg7[%c0_15, %c0_16, %c0_17], %30 {strides = array<i32>} : memref<1x8x8xf32, #tpu.memory_space<vmem>>, vector<1x8x8xf32>,
    return
  }
  func.func @transform_0(%arg0: i32) -> (i32, i32, i32) {
    %c0_i32 = arith.constant 0 : i32
    %c0_i32_0 = arith.constant 0 : i32
    %c0_i32_1 = arith.constant 0 : i32
    return %arg0, %c0_i32, %c0_i32_0 : i32, i32, i32
  }
  func.func @transform_1(%arg0: i32) -> (i32, i32) {
    %c0_i32 = arith.constant 0 : i32
    %c0_i32_0 = arith.constant 0 : i32
    %c0_i32_1 = arith.constant 0 : i32
    return %c0_i32, %c0_i32_0 : i32, i32
  }
  func.func @transform_2(%arg0: i32) -> (i32, i32) {
    %c0_i32 = arith.constant 0 : i32
    %c0_i32_0 = arith.constant 0 : i32
    %c0_i32_1 = arith.constant 0 : i32
    return %c0_i32, %c0_i32_0 : i32, i32
  }
  func.func @transform_3(%arg0: i32) -> (i32, i32) {
    %c0_i32 = arith.constant 0 : i32
    %c0_i32_0 = arith.constant 0 : i32
    %c0_i32_1 = arith.constant 0 : i32
    return %c0_i32, %c0_i32_0 : i32, i32
  }
  func.func @transform_4(%arg0: i32) -> (i32, i32) {
    %c0_i32 = arith.constant 0 : i32
    %c0_i32_0 = arith.constant 0 : i32
    %c0_i32_1 = arith.constant 0 : i32
    return %c0_i32, %c0_i32_0 : i32, i32
  }
  func.func @transform_5(%arg0: i32) -> (i32, i32) {
    %c0_i32 = arith.constant 0 : i32
    %c0_i32_0 = arith.constant 0 : i32
    %c0_i32_1 = arith.constant 0 : i32
    return %c0_i32, %c0_i32_0 : i32, i32
  }
  func.func @transform_6(%arg0: i32) -> (i32, i32, i32) {
    %c0_i32 = arith.constant 0 : i32
    %c0_i32_0 = arith.constant 0 : i32
    %c0_i32_1 = arith.constant 0 : i32
    return %arg0, %c0_i32, %c0_i32_0 : i32, i32, i32
  }
}

</mosaic_0001>

<bundles_post_ra>
// kernel: down_block.3
= control target key start
LH: loop header
LB: loop body
LE: loop exit
PB: predicated region body
PF: predicated region fallthrough
CT: control target
= control target key end

     0   :  { %s378_s12 = smov 0   ;;  %s418_s0 = inlined_call_operand.vmem [shape: bf16[2,4,8], index: 0, kind: input, shape index: {}]   ;;  %s419_s1 = inlined_call_operand.vmem [shape: bf16[8,12], index: 1, kind: input, shape index: {}]   ;;  %s420_s2 = inlined_call_operand.vmem [shape: bf16[2,8,8], index: 2, kind: output, shape index: {0}]   ;;  %s421_s3 = inlined_call_operand.vmem [shape: f32[8,2], index: 3, kind: output, shape index: {1}]  }
   0x1 LB: > { %s384_s13 = sadd.s32 4294967295, %s351_s12   ;;  %p317_p0 = scmp.ge.s32.totalorder %s351_s12, 1  ;;  %s351_s12 = sphi %s378_s12, %s14_s12  }
   0x2   : > { %p134_p1 = scmp.lt.s32.totalorder %s351_s12, 3 }
   0x4   : > { %p135_p2 = pnand %p317_p0, %p134_p1 }
   0x5   : > { %p156_p3 = scmp.lt.s32.totalorder (!%p135_p2), %s384_s13, 1  ;;  %v353_v0 = vmov (!%p135_p2), 0.0   ;;  %vm354_vm0 = vmmov (!%p135_p2), 0   ;;  %s355_s19 = smov (!%p135_p2), 1   ;;  %vm171_vm1 = vcmask (!%p135_p2), 7168   ;;  %vm176_vm2 = vcmask (!%p135_p2), 56320  }
   0x6   : > { %138 = sbr.rel (%p135_p2) target bundleno = 510 (0x1fe), region = 28  ;;  %326 = vmatprep.subr.bf16.mxu0 (!%p135_p2), %v353_v0  ;;  %328 = vmatprep.mubr.msk.bf16.mxu0 (!%p135_p2), %vm354_vm0, %v353_v0  ;;  %s356_s20 = smov (!%p135_p2), 127   ;;  %vm180_vm3 = vcmask (!%p135_p2), 1043456   ;;  %vm188_vm4 = vcmask (!%p135_p2), 1045504   ;;  %v183_v11 = vld [vmem:[%s419_s1] sm:$0xf] (!%p135_p2) }
   0x7   : > { %vm184_vm5 = vcmask (!%p135_p2), 97280   ;;  %vm235_vm6 = vcmask (!%p135_p2), 64512   ;;  %vm233_vm7 = vcmask (!%p135_p2), 60416   ;;  %p321_p4 = scmp.ne.s32.totalorder (!%p135_p2), %s384_s13, 0 }
   0xd   : > { %s390_s14 = scalar_select %p156_p3, %s384_s13, 1 }
   0xe   : > { %vm248_vm8 = vcmask (!%p321_p4), 15360   ;;  %v357_v23 = vmov (!%p321_p4), 0.0  }
   0xf   : > { %s318_s15 = sshll.u32 %s390_s14, 1  ;;  %s319_s23 = sshll.u32 %s390_s14, 2  ;;  %249 = vst.msk [vmem:[%s421_s3] sm:$0xff] (!%p321_p4), %vm248_vm8, %v357_v23 }
  0x10   : > { %s159_s18 = scalar_lea.vmem %s418_s0, %s318_s15  ;;  %s163_s26 = scalar_lea.vmem %s420_s2, %s319_s23 }
  0x11   : > { %v165_v1 = vld [vmem:[%s159_s18] sm:$0x3] }
  0x12   : > { %v166_v2 = vunpack.c.l.bf16 %v165_v1 }
  0x14   : > { %168 = vrot.lane.b32.xlu0 %v166_v2, %s355_s19  ;;  %v178_v4 = vcombine.low %v166_v2, %v166_v2 }
  0x18   : > { %173 = vrot.lane.b32.xlu0 %v166_v2, %s356_s20 }
  0x86   : > { %v169_v3 = vpop.permute.xlu0 %168 }
  0x87   : > { %v172_v5 = vsel %vm171_vm1, 0.0, %v169_v3 }
  0x88   : > { %v181_v8 = vsel %vm180_vm3, %v172_v5, %v178_v4 }
  0x8a   : > { %v174_v6 = vpop.permute.xlu0 %173 }
  0x8b   : > { %v177_v7 = vsel %vm176_vm2, %v174_v6, 0.0 }
  0x8c   : > { %v182_v9 = vpack.c.bf16 %v177_v7, %v181_v8 }
  0x8e   : > { %v190_v10 = vsel %vm188_vm4, %v182_v9, 0 }
  0x8f   : > { %327 = vmatpush3.bf16.msra.mxu0 %v190_v10 }
  0x92   : > { %329 = vmatmul.mubr.msk.bf16.vlgmr.msra.gmra.mrb[0].mxu0 %vm184_vm5, %v183_v11 }
 0x165   : > { %v226_v12 = vpop.f32.mrb[0].mxu0 }
 0x166   : > { %v232_v13 = vpack.c.bf16 %v226_v12, %v226_v12  ;;  %v330_v14 = vpop.f32.mrb[1].mxu0  ;;  %v236_v15 = vsel %vm235_vm6, %v226_v12, 0.0  ;;  %v239_v16 = vmul.f32 %v226_v12, %v226_v12 }
 0x167   : > { %237 = vadd.xlane.f32.xlu1 %v236_v15  ;;  %v229_v17 = vpop.f32.mrb[2].mxu0 }
 0x168   : > { %234 = vst.msk [vmem:[%s163_s26] sm:$0xf] %vm233_vm7, %v232_v13  ;;  %v331_v18 = vpop.f32.mrb[3].mxu0  ;;  %v240_v19 = vsel %vm235_vm6, %v239_v16, 0.0 }
 0x16b   : > { %241 = vadd.xlane.f32.xlu1 %v240_v19 }
 0x1f3   : > { %247 = sbr.rel (%p321_p4) target bundleno = 506 (0x1fa), region = 32 }
 0x1f4   : > { %v238_v20 = vpop.xlane.xlu1 %237 }
 0x1f8   : > { %v242_v21 = vpop.xlane.xlu1 %241 }
 0x1f9   : > { %v243_v22 = vsel %vm171_vm1, %v238_v20, %v242_v21 }
 0x1fa PF: > { %v250_v24 = vld [vmem:[%s421_s3] sm:$0xff]  ;;  %vm252_vm9 = vcmask 15360  }
 0x1fb   : > { %v251_v25 = vadd.f32 %v250_v24, %v243_v22 }
 0x1fd   : > { %253 = vst.msk [vmem:[%s421_s3] sm:$0xff] %vm252_vm9, %v251_v25 }
 0x1fe PF: > { %s14_s12 = sadd.s32 1, %s351_s12  }
 0x1ff   : > { %p11_p5 = scmp.ge.s32.totalorder %s14_s12, 4  }
 0x201   :  { %13 = sbr.rel (!%p11_p5) target bundleno = 1 (0x1), region = 70 }

// kernel: down_block.5
= control target key start
LH: loop header
LB: loop body
LE: loop exit
PB: predicated region body
PF: predicated region fallthrough
CT: control target
= control target key end

     0   :  { %11 = vsyncpa [#allocation3], 0  ;;  %s711_s0 = inlined_call_operand.vmem [shape: bf16[2,8,8], index: 0, kind: input, shape index: {}]   ;;  %s712_s1 = inlined_call_operand.vmem [shape: f32[8,1], index: 1, kind: input, shape index: {}]   ;;  %s713_s2 = inlined_call_operand.vmem [shape: f32[8,1], index: 2, kind: input, shape index: {}]   ;;  %s714_s3 = inlined_call_operand.vmem [shape: bf16[8,24], index: 3, kind: input, shape index: {}]   ;;  %s715_s4 = inlined_call_operand.vmem [shape: f32[8,1], index: 4, kind: input, shape index: {}]   ;;  %s716_s5 = inlined_call_operand.vmem [shape: f32[8,1], index: 5, kind: input, shape index: {}]   ;;  %s717_s6 = inlined_call_operand.hbm [shape: f32[2,8,8], index: 6, kind: output, shape index: {}]  }
   0x1   :  { %13 = vsyncpa [#allocation3 + $0x1], 0  ;;  %s596_s21 = smov 0   ;;  %s598_s22 = smov 0  }
   0x2   :  { %s600_s23 = smov 0   ;;  %s602_s24 = smov 0  }
   0x3 LB: > { %s617_s25 = sadd.s32 4294967295, %s552_s24   ;;  %s417_s26 = sadd.s32 4294967294, %s552_s24   ;;  %s552_s24 = sphi %s602_s24, %s723_s24   ;;  %s548_s23 = sphi %s600_s23, %s722_s23   ;;  %s544_s22 = sphi %s598_s22, %s721_s22   ;;  %s540_s21 = sphi %s596_s21, %s720_s21  }
   0x4   : > { %s621_s27 = sadd.s32 1, %s552_s24   ;;  %s157_s28 = sadd.s32 1, %s548_s23 }
   0x5   : > { %s154_s29 = ssub.s32 %s552_s24, %s621_s27  ;;  %p167_p0 = scmp.ne.s32.totalorder %s548_s23, %s544_s22 }
   0x6   : > { %p155_p1 = scmp.eq.s32.totalorder %s154_s29, 0  ;;  %p168_p2 = scmp.eq.s32.totalorder %s617_s25, 1 }
   0x7   : > { %p173_p3 = scmp.ne.s32.totalorder %s544_s22, %s540_s21  ;;  %p174_p4 = scmp.eq.s32.totalorder %s417_s26, 1 }
   0x8   : > { %s632_s30 = scalar_select %p155_p1, %s548_s23, %s157_s28  }
   0x9   : > { %p634_p5 = por %p168_p2, %p167_p0  ;;  %p638_p6 = por %p174_p4, %p173_p3 }
   0xa   : > { %p420_p7 = scmp.ge.s32.totalorder %s552_s24, 1  ;;  %p214_p8 = scmp.lt.s32.totalorder %s552_s24, 3 }
   0xc   : > { %p215_p9 = pnand %p420_p7, %p214_p8 }
   0xd   : > { %v250_v0 = vld [vmem:[%s712_s1] sm:$0xff] (!%p215_p9)  ;;  %v554_v1 = vmov (!%p215_p9), 0   ;;  %p243_p10 = scmp.lt.s32.totalorder (!%p215_p9), %s617_s25, 1  ;;  %v555_v5 = vmov (!%p215_p9), 0.0   ;;  %vm556_vm0 = vmmov (!%p215_p9), 0   ;;  %s557_s20 = smov (!%p215_p9), 1  }
   0xe   : > { %218 = sbr.rel (%p215_p9) target bundleno = 509 (0x1fd), region = 44  ;;  %488 = vset.pattern.permute.xlu0 (!%p215_p9), %v554_v1  ;;  %489 = vset.pattern.permute.xlu1 (!%p215_p9), %v554_v1  ;;  %v257_v2 = vld [vmem:[%s713_s2] sm:$0xff] (!%p215_p9)  ;;  %s558_s26 = smov (!%p215_p9), 127   ;;  %vm269_vm1 = vcmask (!%p215_p9), 7168   ;;  %vm559_vm3 = vmmov (!%p215_p9), 1   ;;  %vm274_vm5 = vcmask (!%p215_p9), 56320  }
   0xf   : > { %253 = vperm.xlu0 (!%p215_p9), %488, %v250_v0   ;;  %v327_v3 = vld [vmem:[%s715_s4] sm:$0xff] (!%p215_p9)  ;;  %435 = vmatprep.subr.bf16.mxu0 (!%p215_p9), %v555_v5  ;;  %vm423_vm2 = vmneg (!%p215_p9), %vm269_vm1  ;;  %vm283_vm6 = vcmask (!%p215_p9), 1043456   ;;  %vm279_vm7 = vcmask (!%p215_p9), 195584   ;;  %s240_s11 = sand.u32 (!%p215_p9), 1, %s544_s22   ;;  %s429_s13 = sshll.u32 (!%p215_p9), %s617_s25, 7  ;;  %vm342_vm8 = vcmask (!%p215_p9), 64512  }
  0x10   : > { %439 = vmatprep.mubr.msk.bf16.mxu0 (!%p215_p9), %vm556_vm0, %v555_v5  ;;  %v334_v12 = vld [vmem:[%s716_s5] sm:$0xff] (!%p215_p9)  ;;  %vm424_vm4 = vmpackc.low (!%p215_p9), %vm559_vm3, %vm423_vm2  ;;  %s421_s12 = sshll.u32 (!%p215_p9), %s240_s11, 3  ;;  %s669_s18 = scalar_lea.hbm (!%p215_p9), %s717_s6, %s429_s13 }
  0x11   : > { %v278_v19 = vld [vmem:[%s714_s3] sm:$0xf] (!%p215_p9)  ;;  %s242_s14 = scalar_lea.vmem (!%p215_p9), [#allocation2], %s421_s12 }
  0x13   : > { %260 = vperm.xlu0 (!%p215_p9), %488, %v257_v2  }
  0x15   : > { %s244_s15 = scalar_select %p243_p10, %s617_s25, 1 }
  0x16   : > { %s560_s25 = smov [#allocation2]  }
  0x17   : > { %330 = vperm.xlu0 %488, %v327_v3   ;;  %s422_s16 = sshll.u32 %s244_s15, 2  ;;  %s358_s15 = sshll.u32 %s242_s14, 4  ;;  %s671_s15 = int_to_ptr.vmem [resolvable:$true] %s358_s15 }
  0x18   : > { %s246_s19 = scalar_lea.vmem %s711_s0, %s422_s16 }
  0x19   : > { %v248_v4 = vld [vmem:[%s246_s19] sm:$0xf]  ;;  %s345_s19 = scalar_lea.sflag [#allocation3], %s240_s11 }
  0x1a   : > { %v249_v6 = vunpack.c.l.bf16 %v248_v4 }
  0x8e   : > { %v254_v7 = vpop.permute.xlu0 %253 }
  0x8f   : > { %v256_v8 = vmul.f32 %v254_v7, %v249_v6 }
  0x92   : > { %v261_v9 = vpop.permute.xlu0 %260 }
  0x93   : > { %v263_v10 = vadd.f32 %v261_v9, %v256_v8 }
  0x95   : > { %v264_v11 = vmax.f32 %v263_v10, 0.0 }
  0x96   : > { %v331_v20 = vpop.permute.xlu0 %330 }
  0x97   : > { %266 = vrot.lane.b32.xlu1 %v264_v11, %s557_s20  ;;  %s490_s20 = scalar_lea.vmem %s671_s15, 128 }
  0x98   : > { %p491_p11 = scmp.ne.s32.totalorder %s671_s15, %s490_s20 }
  0x9a   : > { %p492_p12 = pnand %p491_p11, %p634_p5 }
  0x9b   : > { %271 = vrot.lane.b32.xlu1 %v264_v11, %s558_s26  ;;  %s494_s26 = sshll.u32 %s560_s25, 4  ;;  %s495_s26 = int_to_ptr.vmem [resolvable:$false] %s494_s26 }
  0x9c   : > { %p493_p13 = pneg %p492_p12  ;;  %s496_s28 = scalar_lea.vmem %s495_s26, 256 }
  0x9d   : > { %p497_p0 = scmp.lt.s32.totalorder %s671_s15, %s495_s26  ;;  %p498_p1 = scmp.lt.s32.totalorder %s496_s28, %s490_s20 }
  0x9f   : > { %337 = vperm.xlu1 %489, %v334_v12   ;;  %p499_p2 = por %p498_p1, %p497_p0 }
  0xa1   : > { %p500_p3 = pnand %p499_p2, %p493_p13 }
 0x109   : > { %v267_v13 = vpop.permute.xlu1 %266 }
 0x10a   : > { %v425_v14 = vpack.c.bf16 %v264_v11, %v267_v13 }
 0x10c   : > { %436 = vmatpush3.bf16.msk.msra.mxu0 %vm424_vm4, %v425_v14 }
 0x10d   : > { %v272_v15 = vpop.permute.xlu1 %271  ;;  %437 = vmatprep.subr.bf16.mxu0 %v555_v5 }
 0x10e   : > { %v275_v16 = vsel %vm274_vm5, %v272_v15, 0.0 }
 0x10f   : > { %v277_v17 = vpack.c.bf16 %v275_v16, %v275_v16 }
 0x111   : > { %v285_v18 = vsel %vm283_vm6, %v277_v17, 0 }
 0x112   : > { %438 = vmatpush3.bf16.msra.mxu0 %v285_v18 }
 0x115   : > { %440 = vmatmul.mubr.msk.bf16.vlgmr.msra.gmra.mrb[0].mxu0 %vm279_vm7, %v278_v19 }
 0x11e   : > { %v338_v22 = vpop.permute.xlu1 %337 }
 0x1e8   : > { %v321_v21 = vpop.f32.mrb[0].mxu0 }
 0x1e9   : > { %v333_v23 = vmul.f32 %v331_v20, %v321_v21  ;;  %v441_v24 = vpop.f32.mrb[1].mxu0 }
 0x1ea   : > { %v324_v25 = vpop.f32.mrb[2].mxu0 }
 0x1eb   : > { %v340_v26 = vadd.f32 %v338_v22, %v333_v23  ;;  %v442_v27 = vpop.f32.mrb[3].mxu0 }
 0x1ed   : > { %v341_v28 = vmax.f32 %v340_v26, 0.0 }
 0x1ef   : > { %343 = vst.msk [vmem:[%s242_s14] sm:$0xff] %vm342_vm8, %v341_v28 }
 0x1f0   : > { %503 = shalt.err (!%p500_p3)
}
 0x1f1   : > { %s504_s29 = scalar_lea.hbm %s669_s18, 128  ;;  %s508_s11 = scalar_lea.hbm %s717_s6, 256 }
 0x1f2   : > { %p505_p4 = scmp.ne.s32.totalorder %s669_s18, %s504_s29  ;;  %p509_p9 = scmp.lt.u32.totalorder %s669_s18, %s717_s6 }
 0x1f3   : > { %p510_p10 = scmp.lt.u32.totalorder %s508_s11, %s504_s29  ;;  %p512_p12 = scmp.lt.u32.totalorder %s504_s29, %s669_s18 }
 0x1f4   : > { %p506_p7 = pnand %p505_p4, %p634_p5 }
 0x1f5   : > { %p511_p11 = por %p510_p10, %p509_p9 }
 0x1f6   : > { %p507_p8 = pneg %p506_p7 }
 0x1f7   : > { %p513_p13 = por %p512_p12, %p511_p11 }
 0x1f9   : > { %p514_p0 = pnand %p513_p13, %p507_p8 }
 0x1fb   : > { %517 = shalt.err (!%p514_p0)
}
 0x1fc   : > { %443 = dma.vmem_to_hbm [thread:$0]  (%p634_p5), %s671_s15, 128, %s669_s18, %s345_s19  }
 0x1fd PF: > { %p449_p1 = scmp.ge.s32.totalorder %s552_s24, 2  ;;  %s370_s14 = sand.u32 1, %s540_s21  }
 0x1fe   : > { %s371_s16 = scalar_lea.sflag [#allocation3], %s370_s14 }
 0x1ff   : > { %p446_p2 = pnand %p449_p1, %p638_p6 }
 0x201   : > { %535 = dma.done.wait (!%p446_p2), %s371_s16, 128  }
 0x202   : > { %537 = vsyncadd (!%p446_p2), %s371_s16, 4294967168  ;;  %p16_p3 = scmp.ge.s32.totalorder %s621_s27, 4   ;;  %s720_s21 = smov %s544_s22 }
 0x203   : > { %s721_s22 = smov %s548_s23  ;;  %s722_s23 = smov %s632_s30 }
 0x204   : > { %s723_s24 = smov %s621_s27  ;;  %18 = sbr.rel (!%p16_p3) target bundleno = 3 (0x3), region = 79 }
 0x20b   :  { %376 = vsyncpa [#allocation3], 1 }
 0x20c   :  { %378 = vsyncpa [#allocation3 + $0x1], 1 }

// kernel: down_block.4
= control target key start
LH: loop header
LB: loop body
LE: loop exit
PB: predicated region body
PF: predicated region fallthrough
CT: control target
= control target key end

     0   :  { %s387_s15 = smov 0   ;;  %s426_s0 = inlined_call_operand.vmem [shape: bf16[2,8,8], index: 0, kind: input, shape index: {}]   ;;  %s427_s1 = inlined_call_operand.vmem [shape: f32[8,1], index: 1, kind: input, shape index: {}]   ;;  %s428_s2 = inlined_call_operand.vmem [shape: f32[8,1], index: 2, kind: input, shape index: {}]   ;;  %s429_s3 = inlined_call_operand.vmem [shape: bf16[8,24], index: 3, kind: input, shape index: {}]   ;;  %s430_s4 = inlined_call_operand.vmem [shape: f32[8,2], index: 4, kind: output, shape index: {}]  }
   0x1 LB: > { %s393_s16 = sadd.s32 4294967295, %s353_s15   ;;  %p310_p0 = scmp.ge.s32.totalorder %s353_s15, 1  ;;  %s353_s15 = sphi %s387_s15, %s14_s15  }
   0x2   : > { %p156_p1 = scmp.lt.s32.totalorder %s353_s15, 3 }
   0x4   : > { %p157_p2 = pnand %p310_p0, %p156_p1 }
   0x5   : > { %v183_v0 = vld [vmem:[%s427_s1] sm:$0xff] (!%p157_p2)  ;;  %v355_v1 = vmov (!%p157_p2), 0   ;;  %p176_p3 = scmp.lt.s32.totalorder (!%p157_p2), %s393_s16, 1  ;;  %v356_v4 = vmov (!%p157_p2), 0.0   ;;  %vm357_vm0 = vmmov (!%p157_p2), 0   ;;  %s358_s26 = smov (!%p157_p2), 1  }
   0x6   : > { %160 = sbr.rel (%p157_p2) target bundleno = 631 (0x277), region = 36  ;;  %346 = vset.pattern.permute.xlu0 (!%p157_p2), %v355_v1  ;;  %v190_v2 = vld [vmem:[%s428_s2] sm:$0xff] (!%p157_p2)  ;;  %323 = vmatprep.subr.bf16.mxu0 (!%p157_p2), %v356_v4  ;;  %s359_s27 = smov (!%p157_p2), 127   ;;  %vm202_vm1 = vcmask (!%p157_p2), 7168   ;;  %vm360_vm3 = vmmov (!%p157_p2), 1   ;;  %vm207_vm5 = vcmask (!%p157_p2), 56320  }
   0x7   : > { %186 = vperm.xlu0 (!%p157_p2), %346, %v183_v0   ;;  %327 = vmatprep.mubr.msk.bf16.mxu0 (!%p157_p2), %vm357_vm0, %v356_v4  ;;  %vm312_vm2 = vmneg (!%p157_p2), %vm202_vm1  ;;  %vm216_vm6 = vcmask (!%p157_p2), 1043456   ;;  %v211_v17 = vld [vmem:[%s429_s3] sm:$0xf] (!%p157_p2)  ;;  %vm212_vm7 = vcmask (!%p157_p2), 195584   ;;  %vm260_vm8 = vcmask (!%p157_p2), 64512   ;;  %p317_p4 = scmp.ne.s32.totalorder (!%p157_p2), %s393_s16, 0 }
   0x8   : > { %vm313_vm4 = vmpackc.low (!%p157_p2), %vm360_vm3, %vm312_vm2 }
   0xb   : > { %193 = vperm.xlu0 (!%p157_p2), %346, %v190_v2  }
   0xd   : > { %s177_s21 = scalar_select %p176_p3, %s393_s16, 1 }
   0xe   : > { %vm273_vm9 = vcmask (!%p317_p4), 15360   ;;  %v361_v28 = vmov (!%p317_p4), 0.0  }
   0xf   : > { %s311_s22 = sshll.u32 %s177_s21, 2  ;;  %274 = vst.msk [vmem:[%s430_s4] sm:$0xff] (!%p317_p4), %vm273_vm9, %v361_v28 }
  0x10   : > { %s179_s25 = scalar_lea.vmem %s426_s0, %s311_s22 }
  0x11   : > { %v181_v3 = vld [vmem:[%s179_s25] sm:$0xf] }
  0x12   : > { %v182_v5 = vunpack.c.l.bf16 %v181_v3 }
  0x86   : > { %v187_v6 = vpop.permute.xlu0 %186 }
  0x87   : > { %v189_v7 = vmul.f32 %v187_v6, %v182_v5 }
  0x8a   : > { %v194_v8 = vpop.permute.xlu0 %193 }
  0x8b   : > { %v196_v9 = vadd.f32 %v194_v8, %v189_v7 }
  0x8d   : > { %v197_v10 = vmax.f32 %v196_v9, 0.0 }
  0x8f   : > { %199 = vrot.lane.b32.xlu1 %v197_v10, %s358_s26 }
  0x93   : > { %204 = vrot.lane.b32.xlu1 %v197_v10, %s359_s27 }
 0x101   : > { %v200_v11 = vpop.permute.xlu1 %199 }
 0x102   : > { %v314_v12 = vpack.c.bf16 %v197_v10, %v200_v11 }
 0x104   : > { %324 = vmatpush3.bf16.msk.msra.mxu0 %vm313_vm4, %v314_v12 }
 0x105   : > { %v205_v13 = vpop.permute.xlu1 %204  ;;  %325 = vmatprep.subr.bf16.mxu0 %v356_v4 }
 0x106   : > { %v208_v14 = vsel %vm207_vm5, %v205_v13, 0.0 }
 0x107   : > { %v210_v15 = vpack.c.bf16 %v208_v14, %v208_v14 }
 0x109   : > { %v218_v16 = vsel %vm216_vm6, %v210_v15, 0 }
 0x10a   : > { %326 = vmatpush3.bf16.msra.mxu0 %v218_v16 }
 0x10d   : > { %328 = vmatmul.mubr.msk.bf16.vlgmr.msra.gmra.mrb[0].mxu0 %vm212_vm7, %v211_v17 }
 0x1e0   : > { %v254_v18 = vpop.f32.mrb[0].mxu0 }
 0x1e1   : > { %v264_v19 = vmul.f32 %v254_v18, %v254_v18  ;;  %v329_v20 = vpop.f32.mrb[1].mxu0  ;;  %v261_v21 = vsel %vm260_vm8, %v254_v18, 0.0 }
 0x1e2   : > { %262 = vadd.xlane.f32.xlu0 %v261_v21  ;;  %v257_v22 = vpop.f32.mrb[2].mxu0 }
 0x1e3   : > { %v330_v23 = vpop.f32.mrb[3].mxu0  ;;  %v265_v24 = vsel %vm260_vm8, %v264_v19, 0.0 }
 0x1e4   : > { %266 = vadd.xlane.f32.xlu1 %v265_v24 }
 0x26c   : > { %272 = sbr.rel (%p317_p4) target bundleno = 627 (0x273), region = 40 }
 0x26f   : > { %v263_v25 = vpop.xlane.xlu0 %262 }
 0x271   : > { %v267_v26 = vpop.xlane.xlu1 %266 }
 0x272   : > { %v268_v27 = vsel %vm202_vm1, %v263_v25, %v267_v26 }
 0x273 PF: > { %v275_v29 = vld [vmem:[%s430_s4] sm:$0xff]  ;;  %vm277_vm10 = vcmask 15360  }
 0x274   : > { %v276_v30 = vadd.f32 %v275_v29, %v268_v27 }
 0x276   : > { %278 = vst.msk [vmem:[%s430_s4] sm:$0xff] %vm277_vm10, %v276_v30 }
 0x277 PF: > { %s14_s15 = sadd.s32 1, %s353_s15  }
 0x278   : > { %p11_p5 = scmp.ge.s32.totalorder %s14_s15, 4  }
 0x27a   :  { %13 = sbr.rel (!%p11_p5) target bundleno = 1 (0x1), region = 66 }

</bundles_post_ra>
